<compile_context>
chip_gen: v5e
topology: v5e:2x2
jax: 0.10.0
libtpu: 0.0.40
codegen_flags: <defaults>
</compile_context>

<pallas_src>
import jax
import jax.numpy as jnp
from jax.experimental import pallas as pl
from jax.experimental.pallas import tpu as pltpu


def _round_up(n, m):
    return ((n + m - 1) // m) * m


def policy_network_kernel(
    x_ref, mask_ref,
    w1_ref, w2_ref, w3_ref, b123_ref,
    wh_ref, bh_ref,
    out_ref,
):
    x = x_ref[...]
    b = b123_ref[...]                      # (3, hidden): b1 | b2 | b3

    h = jnp.maximum(jnp.dot(x, w1_ref[...], preferred_element_type=jnp.float32) + b[0:1, :], 0.0)
    h = jnp.maximum(jnp.dot(h, w2_ref[...], preferred_element_type=jnp.float32) + b[1:2, :], 0.0)
    h = jnp.maximum(jnp.dot(h, w3_ref[...], preferred_element_type=jnp.float32) + b[2:3, :], 0.0)

    # Fused head: columns [0:n_cards] = policy head, column n_cards = value head,
    # remaining lanes are zero padding (lane-dense width = multiple of 128).
    head = jnp.dot(h, wh_ref[...], preferred_element_type=jnp.float32) + bh_ref[...]

    # masked_fill(mask == 0, -1e9); mask is pre-padded with ones on the extra lanes
    # so the value/padding columns are never masked.
    logits = jnp.where(mask_ref[...] == 0, jnp.float32(-1e9), head)

    # Numerically-stable sigmoid: avoids exp(+1e9) = inf on masked lanes.
    # (pl.reciprocal(..., approx=True) would push the divide onto the idle EUP slot.)
    z = jnp.exp(-jnp.abs(logits))
    inv = pl.reciprocal(1.0 + z, approx=False)
    probs = jnp.where(logits >= 0.0, inv, z * inv)

    value = jnp.tanh(head)                 # wrapper picks column n_cards

    # One lane-dense (3, bb, 128) output slab: three full-tile unmasked stores.
    out_ref[0] = logits
    out_ref[1] = probs
    out_ref[2] = value


def policy_network_forward(x, mask, packed, n_cards, *, block_b=256):
    """x: (B, obs_dim) f32, mask: (B, n_cards) int32 (1 = keep, 0 = fill -1e9)."""
    B, obs_dim = x.shape
    hidden = packed["w1"].shape[1]
    out_w = packed["wh"].shape[1]          # lane-padded fused-head width (multiple of 128)

    # Batch tiling: sublane-aligned block, pad B up to a multiple of the block.
    bb = min(block_b, _round_up(B, 8))
    Bp = _round_up(B, bb)

    x_p = jnp.pad(x, ((0, Bp - B), (0, 0))) if Bp != B else x
    mask_p = jnp.pad(mask.astype(jnp.int32),
                     ((0, Bp - B), (0, out_w - n_cards)),
                     constant_values=1)    # extra lanes / rows are never masked

    grid = (Bp // bb,)

    in_specs = [
        pl.BlockSpec((bb, obs_dim), lambda i: (i, 0)),        # x     (streamed over batch)
        pl.BlockSpec((bb, out_w), lambda i: (i, 0)),          # mask  (streamed, lane-dense)
        pl.BlockSpec((obs_dim, hidden), lambda i: (0, 0)),    # w1    (VMEM-resident)
        pl.BlockSpec((hidden, hidden), lambda i: (0, 0)),     # w2
        pl.BlockSpec((hidden, hidden), lambda i: (0, 0)),     # w3
        pl.BlockSpec((3, hidden), lambda i: (0, 0)),          # b1|b2|b3
        pl.BlockSpec((hidden, out_w), lambda i: (0, 0)),      # wp|wv (lane-padded)
        pl.BlockSpec((1, out_w), lambda i: (0, 0)),           # bp|bv (lane-padded)
    ]
    out_spec = pl.BlockSpec((3, bb, out_w), lambda i: (0, i, 0))

    out = pl.pallas_call(
        policy_network_kernel,
        out_shape=jax.ShapeDtypeStruct((3, Bp, out_w), jnp.float32),
        grid_spec=pltpu.PrefetchScalarGridSpec(
            num_scalar_prefetch=0,
            grid=grid,
            in_specs=in_specs,
            out_specs=out_spec,
        ),
        compiler_params=pltpu.CompilerParams(
            dimension_semantics=("parallel",),
        ),
    )(x_p, mask_p,
      packed["w1"], packed["w2"], packed["w3"], packed["b123"],
      packed["wh"], packed["bh"])

    logits = out[0, :B, :n_cards]
    probs = out[1, :B, :n_cards]
    value = out[2, :B, n_cards]            # tanh(value_head) column, squeeze(1)
    return logits, probs, value


def init_params(key, obs_dim, n_cards, hidden_dim):
    """Deterministic synthetic parameters (PyTorch layout: W as (in, out), b as (1, out))."""
    ks = jax.random.split(key, 10)

    def lin(kw, kb, fan_in, fan_out):
        bound = 1.0 / jnp.sqrt(fan_in)
        w = jax.random.uniform(kw, (fan_in, fan_out), jnp.float32, -bound, bound)
        b = jax.random.uniform(kb, (1, fan_out), jnp.float32, -bound, bound)
        return w, b

    w1, b1 = lin(ks[0], ks[1], obs_dim, hidden_dim)
    w2, b2 = lin(ks[2], ks[3], hidden_dim, hidden_dim)
    w3, b3 = lin(ks[4], ks[5], hidden_dim, hidden_dim)
    wp, bp = lin(ks[6], ks[7], hidden_dim, n_cards)
    wv, bv = lin(ks[8], ks[9], hidden_dim, 1)
    return dict(w1=w1, b1=b1, w2=w2, b2=b2, w3=w3, b3=b3,
                wp=wp, bp=bp, wv=wv, bv=bv)


def pack_params(p):
    """One-time layout plumbing: stack fc biases and fuse+lane-pad the two heads."""
    hidden = p["w1"].shape[1]
    n_cards = p["wp"].shape[1]
    out_w = _round_up(n_cards + 1, 128)

    b123 = jnp.concatenate([p["b1"], p["b2"], p["b3"]], axis=0)          # (3, hidden)

    wh = jnp.zeros((hidden, out_w), jnp.float32)
    wh = wh.at[:, :n_cards].set(p["wp"])
    wh = wh.at[:, n_cards:n_cards + 1].set(p["wv"])
    bh = jnp.zeros((1, out_w), jnp.float32)
    bh = bh.at[:, :n_cards].set(p["bp"])
    bh = bh.at[:, n_cards:n_cards + 1].set(p["bv"])

    return dict(w1=p["w1"], w2=p["w2"], w3=p["w3"], b123=b123, wh=wh, bh=bh)


if __name__ == "__main__":
    B, OBS_DIM, N_CARDS, HIDDEN = 8, 32, 16, 32

    key = jax.random.PRNGKey(0)
    k_x, k_mask, k_params = jax.random.split(key, 3)

    x = jax.random.normal(k_x, (B, OBS_DIM), jnp.float32)
    mask = (jax.random.uniform(k_mask, (B, N_CARDS)) > 0.3).astype(jnp.int32)
    params = init_params(k_params, OBS_DIM, N_CARDS, HIDDEN)
    packed = pack_params(params)

    logits, probs, value = policy_network_forward(x, mask, packed, N_CARDS)
    jax.block_until_ready((logits, probs, value))

    # Pure-JAX reference check (original, unfused parameter layout)
    def ref_forward(x, mask, p):
        h = jnp.maximum(x @ p["w1"] + p["b1"], 0.0)
        h = jnp.maximum(h @ p["w2"] + p["b2"], 0.0)
        h = jnp.maximum(h @ p["w3"] + p["b3"], 0.0)
        lg = h @ p["wp"] + p["bp"]
        lg = jnp.where(mask == 0, -1e9, lg)
        pr = jax.nn.sigmoid(lg)
        v = jnp.tanh(h @ p["wv"] + p["bv"])[:, 0]
        return lg, pr, v

    rlg, rpr, rv = ref_forward(x, mask, params)
    assert jnp.allclose(logits, rlg, atol=1e-4, rtol=1e-4)
    assert jnp.allclose(probs, rpr, atol=1e-4, rtol=1e-4)
    assert jnp.allclose(value, rv, atol=1e-4, rtol=1e-4)

    print("KERNEL_OK")
</pallas_src>

<mosaic_0001>
module attributes {stable_mosaic.version = 11 : i64} {
  func.func @policy_network_kernel(%arg0: i32, %arg1: memref<8x32xf32, #tpu.memory_space<vmem>>, %arg2: memref<8x128xi32, #tpu.memory_space<vmem>>, %arg3: memref<32x32xf32, #tpu.memory_space<vmem>>, %arg4: memref<32x32xf32, #tpu.memory_space<vmem>>, %arg5: memref<32x32xf32, #tpu.memory_space<vmem>>, %arg6: memref<3x32xf32, #tpu.memory_space<vmem>>, %arg7: memref<32x128xf32, #tpu.memory_space<vmem>>, %arg8: memref<1x128xf32, #tpu.memory_space<vmem>>, %arg9: memref<3x8x128xf32, #tpu.memory_space<vmem>>) attributes {dimension_semantics = [#tpu.dimension_semantics<parallel>], iteration_bounds = array<i64: 1>, scalar_prefetch = 0 : i64, scratch_operands = 0 : i64, tpu.core_type = #tpu.core_type<tc>, window_params = [{transform_indices = @transform_0, window_bounds = array<i64: 8, 32>}, {transform_indices = @transform_1, window_bounds = array<i64: 8, 128>}, {pipeline_mode = #tpu.pipeline_mode<synchronous>, transform_indices = @transform_2, window_bounds = array<i64: 32, 32>}, {pipeline_mode = #tpu.pipeline_mode<synchronous>, transform_indices = @transform_3, window_bounds = array<i64: 32, 32>}, {pipeline_mode = #tpu.pipeline_mode<synchronous>, transform_indices = @transform_4, window_bounds = array<i64: 32, 32>}, {pipeline_mode = #tpu.pipeline_mode<synchronous>, transform_indices = @transform_5, window_bounds = array<i64: 3, 32>}, {pipeline_mode = #tpu.pipeline_mode<synchronous>, transform_indices = @transform_6, window_bounds = array<i64: 32, 128>}, {pipeline_mode = #tpu.pipeline_mode<synchronous>, transform_indices = @transform_7, window_bounds = array<i64: 1, 128>}, {transform_indices = @transform_8, window_bounds = array<i64: 3, 8, 128>}]} {
    %c0 = arith.constant 0 : index
    %c0_0 = arith.constant 0 : index
    %0 = vector.load %arg1[%c0, %c0_0] : memref<8x32xf32, #tpu.memory_space<vmem>>, vector<8x32xf32>
    %c0_1 = arith.constant 0 : index
    %c0_2 = arith.constant 0 : index
    %1 = vector.load %arg6[%c0_1, %c0_2] : memref<3x32xf32, #tpu.memory_space<vmem>>, vector<3x32xf32>
    %c0_3 = arith.constant 0 : index
    %c0_4 = arith.constant 0 : index
    %2 = vector.load %arg3[%c0_3, %c0_4] : memref<32x32xf32, #tpu.memory_space<vmem>>, vector<32x32xf32>
    %cst = arith.constant dense<0.000000e+00> : vector<8x32xf32>
    %3 = tpu.matmul %0, %2, %cst {dimension_numbers = #tpu.dot_dimension_numbers<[1], [0], [0], [1], [0, 0, 1, 1], [], []>} : vector<8x32xf32>, vector<32x32xf32>, vector<8x32xf32> -> vector<8x32xf32>
    %4 = vector.extract_strided_slice %1 {offsets = [0, 0], sizes = [1, 32], strides = [1, 1]} : vector<3x32xf32> to vector<1x32xf32>
    %5 = vector.broadcast %4 : vector<1x32xf32> to vector<8x32xf32>
    %6 = arith.addf %3, %5 : vector<8x32xf32>
    %cst_5 = arith.constant 0.000000e+00 : f32
    %7 = vector.broadcast %cst_5 : f32 to vector<8x32xf32>
    %8 = arith.maximumf %6, %7 : vector<8x32xf32>
    %c0_6 = arith.constant 0 : index
    %c0_7 = arith.constant 0 : index
    %9 = vector.load %arg4[%c0_6, %c0_7] : memref<32x32xf32, #tpu.memory_space<vmem>>, vector<32x32xf32>
    %cst_8 = arith.constant dense<0.000000e+00> : vector<8x32xf32>
    %10 = tpu.matmul %8, %9, %cst_8 {dimension_numbers = #tpu.dot_dimension_numbers<[1], [0], [0], [1], [0, 0, 1, 1], [], []>} : vector<8x32xf32>, vector<32x32xf32>, vector<8x32xf32> -> vector<8x32xf32>
    %11 = vector.extract_strided_slice %1 {offsets = [1, 0], sizes = [1, 32], strides = [1, 1]} : vector<3x32xf32> to vector<1x32xf32>
    %12 = vector.broadcast %11 : vector<1x32xf32> to vector<8x32xf32>
    %13 = arith.addf %10, %12 : vector<8x32xf32>
    %cst_9 = arith.constant 0.000000e+00 : f32
    %14 = vector.broadcast %cst_9 : f32 to vector<8x32xf32>
    %15 = arith.maximumf %13, %14 : vector<8x32xf32>
    %c0_10 = arith.constant 0 : index
    %c0_11 = arith.constant 0 : index
    %16 = vector.load %arg5[%c0_10, %c0_11] : memref<32x32xf32, #tpu.memory_space<vmem>>, vector<32x32xf32>
    %cst_12 = arith.constant dense<0.000000e+00> : vector<8x32xf32>
    %17 = tpu.matmul %15, %16, %cst_12 {dimension_numbers = #tpu.dot_dimension_numbers<[1], [0], [0], [1], [0, 0, 1, 1], [], []>} : vector<8x32xf32>, vector<32x32xf32>, vector<8x32xf32> -> vector<8x32xf32>
    %18 = vector.extract_strided_slice %1 {offsets = [2, 0], sizes = [1, 32], strides = [1, 1]} : vector<3x32xf32> to vector<1x32xf32>
    %19 = vector.broadcast %18 : vector<1x32xf32> to vector<8x32xf32>
    %20 = arith.addf %17, %19 : vector<8x32xf32>
    %cst_13 = arith.constant 0.000000e+00 : f32
    %21 = vector.broadcast %cst_13 : f32 to vector<8x32xf32>
    %22 = arith.maximumf %20, %21 : vector<8x32xf32>
    %c0_14 = arith.constant 0 : index
    %c0_15 = arith.constant 0 : index
    %23 = vector.load %arg7[%c0_14, %c0_15] : memref<32x128xf32, #tpu.memory_space<vmem>>, vector<32x128xf32>
    %cst_16 = arith.constant dense<0.000000e+00> : vector<8x128xf32>
    %24 = tpu.matmul %22, %23, %cst_16 {dimension_numbers = #tpu.dot_dimension_numbers<[1], [0], [0], [1], [0, 0, 1, 1], [], []>} : vector<8x32xf32>, vector<32x128xf32>, vector<8x128xf32> -> vector<8x128xf32>
    %c0_17 = arith.constant 0 : index
    %c0_18 = arith.constant 0 : index
    %25 = vector.load %arg8[%c0_17, %c0_18] : memref<1x128xf32, #tpu.memory_space<vmem>>, vector<1x128xf32>
    %26 = vector.broadcast %25 : vector<1x128xf32> to vector<8x128xf32>
    %27 = arith.addf %24, %26 : vector<8x128xf32>
    %c0_19 = arith.constant 0 : index
    %c0_20 = arith.constant 0 : index
    %28 = vector.load %arg2[%c0_19, %c0_20] : memref<8x128xi32, #tpu.memory_space<vmem>>, vector<8x128xi32>
    %c0_i32 = arith.constant 0 : i32
    %29 = vector.broadcast %c0_i32 : i32 to vector<8x128xi32>
    %30 = arith.cmpi eq, %28, %29 : vector<8x128xi32>
    %cst_21 = arith.constant -1.000000e+09 : f32
    %31 = vector.broadcast %cst_21 : f32 to vector<8x128xf32>
    %32 = arith.select %30, %31, %27 : vector<8x128xi1>, vector<8x128xf32>
    %33 = math.absf %32 : vector<8x128xf32>
    %cst_22 = arith.constant 0.000000e+00 : f32
    %34 = vector.broadcast %cst_22 : f32 to vector<8x128xf32>
    %35 = arith.subf %34, %33 : vector<8x128xf32>
    %36 = math.exp %35 : vector<8x128xf32>
    %cst_23 = arith.constant 1.000000e+00 : f32
    %37 = vector.broadcast %cst_23 : f32 to vector<8x128xf32>
    %38 = arith.addf %37, %36 : vector<8x128xf32>
    %39 = tpu.reciprocal %38 : vector<8x128xf32> -> vector<8x128xf32>
    %cst_24 = arith.constant 0.000000e+00 : f32
    %40 = vector.broadcast %cst_24 : f32 to vector<8x128xf32>
    %41 = arith.cmpf oge, %32, %40 : vector<8x128xf32>
    %42 = arith.mulf %36, %39 : vector<8x128xf32>
    %43 = arith.select %41, %39, %42 : vector<8x128xi1>, vector<8x128xf32>
    %44 = math.tanh %27 : vector<8x128xf32>
    %c0_25 = arith.constant 0 : index
    %c0_26 = arith.constant 0 : index
    %c0_27 = arith.constant 0 : index
    %45 = vector.load %arg9[%c0_25, %c0_26, %c0_27] : memref<3x8x128xf32, #tpu.memory_space<vmem>>, vector<1x8x128xf32>
    %46 = vector.shape_cast %45 : vector<1x8x128xf32> to vector<8x128xf32>
    %47 = vector.shape_cast %32 : vector<8x128xf32> to vector<1x8x128xf32>
    tpu.vector_store %arg9[%c0_25, %c0_26, %c0_27], %47 {strides = array<i32>} : memref<3x8x128xf32, #tpu.memory_space<vmem>>, vector<1x8x128xf32>,
    %c1 = arith.constant 1 : index
    %c0_28 = arith.constant 0 : index
    %c0_29 = arith.constant 0 : index
    %48 = vector.load %arg9[%c1, %c0_28, %c0_29] : memref<3x8x128xf32, #tpu.memory_space<vmem>>, vector<1x8x128xf32>
    %49 = vector.shape_cast %48 : vector<1x8x128xf32> to vector<8x128xf32>
    %50 = vector.shape_cast %43 : vector<8x128xf32> to vector<1x8x128xf32>
    tpu.vector_store %arg9[%c1, %c0_28, %c0_29], %50 {strides = array<i32>} : memref<3x8x128xf32, #tpu.memory_space<vmem>>, vector<1x8x128xf32>,
    %c2 = arith.constant 2 : index
    %c0_30 = arith.constant 0 : index
    %c0_31 = arith.constant 0 : index
    %51 = vector.load %arg9[%c2, %c0_30, %c0_31] : memref<3x8x128xf32, #tpu.memory_space<vmem>>, vector<1x8x128xf32>
    %52 = vector.shape_cast %51 : vector<1x8x128xf32> to vector<8x128xf32>
    %53 = vector.shape_cast %44 : vector<8x128xf32> to vector<1x8x128xf32>
    tpu.vector_store %arg9[%c2, %c0_30, %c0_31], %53 {strides = array<i32>} : memref<3x8x128xf32, #tpu.memory_space<vmem>>, vector<1x8x128xf32>,
    return
  }
  func.func @transform_0(%arg0: i32) -> (i32, i32) {
    %c0_i32 = arith.constant 0 : i32
    %c0_i32_0 = arith.constant 0 : i32
    return %arg0, %c0_i32 : i32, i32
  }
  func.func @transform_1(%arg0: i32) -> (i32, i32) {
    %c0_i32 = arith.constant 0 : i32
    %c0_i32_0 = arith.constant 0 : i32
    return %arg0, %c0_i32 : i32, i32
  }
  func.func @transform_2(%arg0: i32) -> (i32, i32) {
    %c0_i32 = arith.constant 0 : i32
    %c0_i32_0 = arith.constant 0 : i32
    %c0_i32_1 = arith.constant 0 : i32
    return %c0_i32, %c0_i32_0 : i32, i32
  }
  func.func @transform_3(%arg0: i32) -> (i32, i32) {
    %c0_i32 = arith.constant 0 : i32
    %c0_i32_0 = arith.constant 0 : i32
    %c0_i32_1 = arith.constant 0 : i32
    return %c0_i32, %c0_i32_0 : i32, i32
  }
  func.func @transform_4(%arg0: i32) -> (i32, i32) {
    %c0_i32 = arith.constant 0 : i32
    %c0_i32_0 = arith.constant 0 : i32
    %c0_i32_1 = arith.constant 0 : i32
    return %c0_i32, %c0_i32_0 : i32, i32
  }
  func.func @transform_5(%arg0: i32) -> (i32, i32) {
    %c0_i32 = arith.constant 0 : i32
    %c0_i32_0 = arith.constant 0 : i32
    %c0_i32_1 = arith.constant 0 : i32
    return %c0_i32, %c0_i32_0 : i32, i32
  }
  func.func @transform_6(%arg0: i32) -> (i32, i32) {
    %c0_i32 = arith.constant 0 : i32
    %c0_i32_0 = arith.constant 0 : i32
    %c0_i32_1 = arith.constant 0 : i32
    return %c0_i32, %c0_i32_0 : i32, i32
  }
  func.func @transform_7(%arg0: i32) -> (i32, i32) {
    %c0_i32 = arith.constant 0 : i32
    %c0_i32_0 = arith.constant 0 : i32
    %c0_i32_1 = arith.constant 0 : i32
    return %c0_i32, %c0_i32_0 : i32, i32
  }
  func.func @transform_8(%arg0: i32) -> (i32, i32, i32) {
    %c0_i32 = arith.constant 0 : i32
    %c0_i32_0 = arith.constant 0 : i32
    %c0_i32_1 = arith.constant 0 : i32
    return %c0_i32, %arg0, %c0_i32_0 : i32, i32, i32
  }
}

</mosaic_0001>

<bundles_post_ra>
// kernel: tpu_custom_call.1
= control target key start
LH: loop header
LB: loop body
LE: loop exit
PB: predicated region body
PF: predicated region fallthrough
CT: control target
= control target key end

     0   :  { %13 = vsyncpa [#allocation3], 0  ;;  %s592_s0 = inlined_call_operand.hbm [shape: f32[8,32], index: 0, kind: input, shape index: {}]   ;;  %s593_s1 = inlined_call_operand.hbm [shape: s32[8,128], index: 1, kind: input, shape index: {}]   ;;  %s594_s2 = inlined_call_operand.hbm [shape: f32[32,32], index: 2, kind: input, shape index: {}]   ;;  %s595_s3 = inlined_call_operand.hbm [shape: f32[32,32], index: 3, kind: input, shape index: {}]   ;;  %s596_s4 = inlined_call_operand.hbm [shape: f32[32,32], index: 4, kind: input, shape index: {}]   ;;  %s597_s5 = inlined_call_operand.vmem [shape: f32[3,32], index: 5, kind: input, shape index: {}]   ;;  %s598_s6 = inlined_call_operand.hbm [shape: f32[32,128], index: 6, kind: input, shape index: {}]   ;;  %s599_s7 = inlined_call_operand.vmem [shape: f32[1,128], index: 7, kind: input, shape index: {}]   ;;  %s600_s8 = inlined_call_operand.hbm [shape: f32[3,8,128], index: 8, kind: output, shape index: {}]  }
   0x1   :  { %14 = vsyncpa [#allocation6], 0 }
   0x2   :  { %15 = vsyncpa [#allocation9], 0 }
   0x3   :  { %16 = vsyncpa [#allocation12], 0  ;;  %s34_s29 = sshll.u32 %s593_s1, 4  ;;  %s35_s29 = int_to_ptr.hbm [resolvable:$true] %s34_s29 }
   0x4   :  { %17 = vsyncpa [#allocation4], 0  ;;  %s492_s30 = smov [#allocation5]   ;;  %s57_s12 = sshll.u32 %s595_s3, 4  ;;  %s58_s12 = int_to_ptr.hbm [resolvable:$true] %s57_s12 }
   0x5   :  { %s36_s9 = sshll.u32 %s492_s30, 4  ;;  %s493_s13 = smov [#allocation8]   ;;  %s37_s9 = int_to_ptr.vmem [resolvable:$true] %s36_s9 }
   0x6   :  { %39 = dma.hbm_to_vmem [thread:$0]  %s35_s29, 128, %s37_s9, [#allocation6]  }
   0x7   :  { %s59_s14 = sshll.u32 %s493_s13, 4  ;;  %s23_s17 = sshll.u32 %s592_s0, 4  ;;  %s60_s14 = int_to_ptr.vmem [resolvable:$true] %s59_s14  ;;  %s24_s17 = int_to_ptr.hbm [resolvable:$true] %s23_s17 }
   0x8   :  { %s494_s1 = smov 128   ;;  %s495_s18 = smov 8  }
   0x9   :  { %65 = dma.hbm_to_vmem [thread:$0]  %s58_s12, 512, %s60_s14, [#allocation9], %s494_s1, %s494_s1, %s495_s18  }
   0xa   :  { %s44_s21 = sshll.u32 %s594_s2, 4  ;;  %s496_s3 = smov [#allocation2]   ;;  %s45_s21 = int_to_ptr.hbm [resolvable:$true] %s44_s21 }
   0xb   :  { %s25_s22 = sshll.u32 %s496_s3, 4  ;;  %s497_s23 = smov [#allocation7]   ;;  %s26_s22 = int_to_ptr.vmem [resolvable:$true] %s25_s22 }
   0xc   :  { %28 = dma.hbm_to_vmem [thread:$0]  %s24_s17, 128, %s26_s22, [#allocation3]  }
   0xd   :  { %s46_s24 = sshll.u32 %s497_s23, 4  ;;  %s70_s26 = sshll.u32 %s596_s4, 4  ;;  %s47_s24 = int_to_ptr.vmem [resolvable:$true] %s46_s24  ;;  %s71_s26 = int_to_ptr.hbm [resolvable:$true] %s70_s26 }
   0xe   :  { %52 = dma.hbm_to_vmem [thread:$0]  %s45_s21, 512, %s47_s24, [#allocation6], %s494_s1, %s494_s1, %s495_s18  }
   0xf   :  { %s85_s2 = sshll.u32 %s598_s6, 4  ;;  %s498_s29 = smov [#allocation10]   ;;  %s86_s2 = int_to_ptr.hbm [resolvable:$true] %s85_s2 }
  0x10   :  { %s72_s30 = sshll.u32 %s498_s29, 4  ;;  %s499_s9 = smov [#allocation11]   ;;  %s73_s30 = int_to_ptr.vmem [resolvable:$true] %s72_s30 }
  0x11   :  { %78 = dma.hbm_to_vmem [thread:$0]  %s71_s26, 512, %s73_s30, [#allocation9], %s494_s1, %s494_s1, %s495_s18  }
  0x12   :  { %s87_s4 = sshll.u32 %s499_s9, 4  ;;  %s88_s4 = int_to_ptr.vmem [resolvable:$true] %s87_s4 }
  0x13   :  { %93 = dma.hbm_to_vmem [thread:$0]  %s86_s2, 512, %s88_s4, [#allocation12], %s494_s1, %s494_s1, %s495_s18  }
  0x14   :  { %482 = dma.done.wait [#allocation3], 128  }
  0x15   :  { %483 = vsyncadd [#allocation3], 4294967168 }
  0x16   :  { %484 = dma.done.wait [#allocation6], 640  }
  0x17   :  { %485 = vsyncadd [#allocation6], 4294966656 }
  0x18   :  { %486 = dma.done.wait [#allocation9], 1024  }
  0x19   :  { %487 = vsyncadd [#allocation9], 4294966272 }
  0x1a   :  { %488 = dma.done.wait [#allocation12], 512  }
  0x1b   :  { %489 = vsyncadd [#allocation12], 4294966784  ;;  %v125_v0 = vld [vmem:[#allocation7 + $0x18] sm:$0xff]  ;;  %v124_v1 = vld [vmem:[#allocation7 + $0x10] sm:$0xff]  ;;  %vm127_vm0 = vcmask 261120   ;;  %s278_s15 = sshll.u32 %s600_s8, 4  ;;  %s279_s15 = int_to_ptr.hbm [resolvable:$true] %s278_s15 }
  0x1c   :  { %143 = vmatpush.msra.mxu0 %v125_v0  ;;  %v155_v2 = vld [vmem:[#allocation8 + $0x18] sm:$0xff]  ;;  %v123_v3 = vld [vmem:[#allocation7 + $0x8] sm:$0xff]  ;;  %v122_v4 = vld [vmem:[#allocation7] sm:$0xff] }
  0x1d   :  { %172 = vmatpush.msra.mxu1 %v155_v2  ;;  %v120_v5 = vld [vmem:[#allocation2] sm:$0xff]  ;;  %v153_v7 = vld [vmem:[#allocation8 + $0x8] sm:$0xff]  ;;  %v152_v8 = vld [vmem:[#allocation8] sm:$0xff] }
  0x1e   :  { %144 = vmatpush.msra.mxu0 %v124_v1  ;;  %v154_v6 = vld [vmem:[#allocation8 + $0x10] sm:$0xff]  ;;  %v184_v9 = vld [vmem:[#allocation10 + $0x18] sm:$0xff]  ;;  %v182_v16 = vld [vmem:[#allocation10 + $0x8] sm:$0xff] }
  0x1f   :  { %173 = vmatpush.msra.mxu1 %v154_v6  ;;  %201 = vmatpush.msra.mxu2 %v184_v9  ;;  %v121_v10 = vld [vmem:[%s597_s5] sm:$0x7]  ;;  %v181_v17 = vld [vmem:[#allocation10] sm:$0xff]  ;;  %v213_v18 = vld [vmem:[#allocation11 + $0x18] sm:$0xff] }
  0x20   :  { %145 = vmatpush.msra.mxu0 %v123_v3  ;;  %v126_v11 = vperm.slane %v121_v10, 0  ;;  %v183_v15 = vld [vmem:[#allocation10 + $0x10] sm:$0xff]  ;;  %233 = vmatpush.msra.mxu3 %v213_v18  ;;  %v156_v19 = vperm.slane %v121_v10, 1  ;;  %v211_v24 = vld [vmem:[#allocation11 + $0x8] sm:$0xff]  ;;  %v210_v25 = vld [vmem:[#allocation11] sm:$0xff]  ;;  %v185_v26 = vperm.slane %v121_v10, 2 }
  0x21   :  { %174 = vmatpush.msra.mxu1 %v153_v7  ;;  %202 = vmatpush.msra.mxu2 %v183_v15  ;;  %v212_v23 = vld [vmem:[#allocation11 + $0x10] sm:$0xff]  ;;  %v241_v31 = vld [vmem:[#allocation5] sm:$0xff] }
  0x22   :  { %146 = vmatpush.msra.mxu0 %v122_v4  ;;  %234 = vmatpush.msra.mxu3 %v212_v23  ;;  %v307_v30 = vld [vmem:[%s599_s7] ss:$0 sm:$0xff]  ;;  %vm242_vm1 = vcmp.eq.s32.totalorder %v241_v31, 0  ;;  %s500_s7 = smov [#allocation13]  }
  0x23   :  { %294 = vmatmul.msk.f32.vlgmr.msra.gmra.mxu0 %vm127_vm0, %v120_v5  ;;  %175 = vmatpush.msra.mxu1 %v152_v8  ;;  %s276_s12 = sshll.u32 %s500_s7, 4  ;;  %s277_s12 = int_to_ptr.vmem [resolvable:$true] %s276_s12 }
  0x24   :  { %203 = vmatpush.msra.mxu2 %v182_v16  ;;  %235 = vmatpush.msra.mxu3 %v211_v24 }
  0x26   :  { %204 = vmatpush.msra.mxu2 %v181_v17  ;;  %236 = vmatpush.msra.mxu3 %v210_v25 }
  0xa0   :  { %v148_v12 = vpop.f32.mrf.mxu0 }
  0xa1   :  { %v149_v13 = vadd.f32 %v148_v12, %v126_v11 }
  0xa3   :  { %v151_v14 = vmax.f32 %v149_v13, 0.0 }
  0xa5   :  { %295 = vmatmul.msk.f32.vlgmr.msra.gmra.mxu1 %vm127_vm0, %v151_v14 }
 0x122   :  { %v177_v20 = vpop.f32.mrf.mxu1 }
 0x123   :  { %v178_v21 = vadd.f32 %v177_v20, %v156_v19 }
 0x125   :  { %v180_v22 = vmax.f32 %v178_v21, 0.0 }
 0x127   :  { %296 = vmatmul.msk.f32.vlgmr.msra.gmra.mxu2 %vm127_vm0, %v180_v22 }
 0x1aa   :  { %v206_v27 = vpop.f32.mrf.mxu2 }
 0x1ab   :  { %v207_v28 = vadd.f32 %v206_v27, %v185_v26 }
 0x1ad   :  { %v209_v29 = vmax.f32 %v207_v28, 0.0 }
 0x1af   :  { %297 = vmatmul.msk.f32.vlgmr.msra.gmra.mxu3 %vm127_vm0, %v209_v29 }
 0x232   :  { %v238_v32 = vpop.f32.mrf.mxu3 }
 0x233   :  { %v239_v33 = vadd.f32 %v307_v30, %v238_v32 }
 0x235   :  { %v243_v34 = vsel %vm242_vm1, -1e+09, %v239_v33  ;;  %308 = vtanh.f32 %v239_v33 }
 0x236   :  { %v244_v35 = vand.u32 2147483647, %v243_v34  ;;  %267 = vst [vmem:[#allocation13] sm:$0xff] %v243_v34  ;;  %vm263_vm6 = vcmp.ge.f32.partialorder %v243_v34, 0.0 }
 0x238   :  { %v245_v36 = vsub.f32 0.0, %v244_v35 }
 0x23a   :  { %v246_v37 = vmul.f32 1.442695, %v245_v36 }
 0x23b   :  { %v309_v38 = vpop.eup %308 }
 0x23c   :  { %310 = vpow2.f32 %v246_v37  ;;  %271 = vst [vmem:[#allocation13 + $0x10] sm:$0xff] %v309_v38 }
 0x242   :  { %v311_v39 = vpop.eup %310 }
 0x243   :  { %v248_v40 = vadd.f32 1.0, %v311_v39 }
 0x245   :  { %312 = vrcp.f32 %v248_v40  ;;  %v260_v44 = vand.u32 2147483648, %v248_v40  ;;  %v258_v46 = vand.u32 2147483647, %v248_v40  ;;  %vm254_vm3 = vweird.f32 %v248_v40 }
 0x247   :  { %v261_v48 = vor.u32 1.1754944e-38, %v260_v44  ;;  %vm259_vm5 = vcmp.eq.f32.partialorder %v258_v46, 8.507059e+37 }
 0x24b   :  { %v313_v41 = vpop.eup %312 }
 0x24c   :  { %v250_v42 = vmul.f32 %v313_v41, %v248_v40  ;;  %vm255_vm2 = vweird.f32 %v313_v41 }
 0x24d   :  { %vm256_vm4 = vmor %vm254_vm3, %vm255_vm2 }
 0x24e   :  { %v251_v43 = vsub.f32 1.0, %v250_v42 }
 0x250   :  { %v252_v45 = vmul.f32 %v313_v41, %v251_v43 }
 0x252   :  { %v253_v47 = vadd.f32 %v313_v41, %v252_v45 }
 0x254   :  { %v257_v49 = vsel %vm256_vm4, %v313_v41, %v253_v47 }
 0x255   :  { %v262_v50 = vsel %vm259_vm5, %v261_v48, %v257_v49 }
 0x256   :  { %v264_v51 = vmul.f32 %v311_v39, %v262_v50 }
 0x258   :  { %v265_v52 = vsel %vm263_vm6, %v262_v50, %v264_v51 }
 0x259   :  { %269 = vst [vmem:[#allocation13 + $0x8] sm:$0xff] %v265_v52 }
 0x25a   :  { %284 = dma.vmem_to_hbm [thread:$0]  %s277_s12, 384, %s279_s15, [#allocation4], %s494_s1, %s494_s1, %s495_s18  }
 0x25b   :  { %490 = dma.done.wait [#allocation4], 384  }
 0x25c   :  { %491 = vsyncadd [#allocation4], 4294966912 }
 0x25d   :  { %289 = vsyncpa [#allocation3], 1 }
 0x25e   :  { %290 = vsyncpa [#allocation6], 1 }
 0x25f   :  { %291 = vsyncpa [#allocation9], 1 }
 0x260   :  { %292 = vsyncpa [#allocation12], 1 }
 0x261   :  { %293 = vsyncpa [#allocation4], 1 }

</bundles_post_ra>
